<compile_context>
chip_gen: v7x
topology: tpu7x:2x2x1
jax: 0.10.0
libtpu: 0.0.40
codegen_flags: <defaults>
</compile_context>

<pallas_src>
import functools

import numpy as np
import jax
import jax.numpy as jnp
from jax import lax
from jax.experimental import pallas as pl
from jax.experimental.pallas import tpu as pltpu

_LANES = 128
_CHUNK_ROWS = 256          # inner-loop chunk: keeps intermediates in vregs
_DEFAULT_TILE_ROWS = 2048  # 2048*128*4B = 1 MiB per f32 input buffer
_V7X_TILE_ROWS = 4096      # v7x HBM (~3.2 TB/s/TC) wants bigger blocks


def _round_up(x, m):
    return ((x + m - 1) // m) * m


def _tile_rows_cap():
    """Generation-aware cap on tile rows (bigger on v7x, safe on v5e)."""
    try:
        ver = str(getattr(pltpu.get_tpu_info(), "chip_version", ""))
        if "7" in ver:
            return _V7X_TILE_ROWS
    except Exception:
        pass
    return _DEFAULT_TILE_ROWS


def _dice_kernel(pred_ref, targ_ref, dice_ref, inter_acc, union_acc, *,
                 rows_total, tile_rows, chunk_rows):
    """Grid = (batch, feature_tile).  For each batch element, accumulate
    intersection / union partial sums across feature tiles in vreg-shaped VMEM
    scratch, and emit the per-batch dice on the last feature tile."""
    k = pl.program_id(1)
    num_k = pl.num_programs(1)

    @pl.when(k == 0)
    def _init():
        inter_acc[...] = jnp.zeros_like(inter_acc)
        union_acc[...] = jnp.zeros_like(union_acc)

    # Rows of this block holding real data (static rows_total, traced k).
    # >= tile_rows for all but the (possibly partial) last block.
    rows_valid = rows_total - k * tile_rows

    num_chunks = tile_rows // chunk_rows

    def body(c, carry):
        inter, union = carry
        off = pl.multiple_of(c * chunk_rows, chunk_rows)
        # Native-dtype VMEM tile; per-chunk cast to f32 keeps the HBM stream
        # and the pipelined VMEM block in the input dtype.
        p = pred_ref[0, pl.ds(off, chunk_rows), :].astype(jnp.float32)
        t = targ_ref[0, pl.ds(off, chunk_rows), :].astype(jnp.float32)
        # Mask rows beyond the valid extent (partial last block is garbage).
        row_ids = off + lax.broadcasted_iota(jnp.int32, (chunk_rows, _LANES), 0)
        valid = row_ids < rows_valid
        p = jnp.where(valid, p, 0.0)
        t = jnp.where(valid, t, 0.0)
        # Fold rows into an (8,128) vreg with pure VPU adds; defer the
        # cross-lane XLU reduction to the finalize branch.
        inter = inter + (p * t).reshape(chunk_rows // 8, 8, _LANES).sum(axis=0)
        union = union + (p + t).reshape(chunk_rows // 8, 8, _LANES).sum(axis=0)
        return inter, union

    inter, union = lax.fori_loop(
        0, num_chunks, body, (inter_acc[...], union_acc[...]), unroll=True)
    inter_acc[...] = inter
    union_acc[...] = union

    @pl.when(k == num_k - 1)
    def _finalize():
        i_sum = jnp.sum(inter_acc[...])
        u_sum = jnp.sum(union_acc[...])
        dice = 2.0 * i_sum / (u_sum + 1e-08)
        # Lane-dense store of the per-batch dice (read back as [b, 0, 0]).
        dice_ref[...] = jnp.full(dice_ref.shape, dice, dtype=jnp.float32)


def dice_loss(pred, target, smooth=1e-05):
    """Negative-DICE loss matching PyTorch DICELoss.forward.

    Note: like the reference module, `smooth` is accepted but the forward pass
    uses the hard-coded 1e-08 in the denominator.
    """
    assert pred.shape == target.shape
    N = pred.shape[0]
    F = int(np.prod(pred.shape[1:]))

    p = pred.reshape(N, F)
    t = target.reshape(N, F)
    if F % _LANES != 0:
        # TODO(synk): stream the <128-element lane tail via manual DMA
        # (pl.ANY) instead of this pad; the pad costs one extra read+write of
        # both inputs in this (uncommon) lane-misaligned case.
        pad = _LANES - F % _LANES
        p = jnp.pad(p, ((0, 0), (0, pad)))
        t = jnp.pad(t, ((0, 0), (0, pad)))
    R = (F + _LANES - 1) // _LANES          # rows of 128 lanes per batch elem
    p = p.reshape(N, R, _LANES)             # layout-preserving (free) reshape
    t = t.reshape(N, R, _LANES)

    # Tile-rows selection: respect the packed-sublane multiple of the native
    # dtype, chunk-align large tiles, and cap generation-aware.
    packing = max(1, 4 // max(1, pred.dtype.itemsize))
    sub = 8 * packing                       # f32 -> 8, bf16 -> 16, int8 -> 32
    if R <= _CHUNK_ROWS:
        tile_rows = _round_up(R, sub)
        chunk_rows = tile_rows
    else:
        tile_rows = min(_tile_rows_cap(), _round_up(R, _CHUNK_ROWS))
        chunk_rows = _CHUNK_ROWS
    K = -(-R // tile_rows)                  # cdiv; last block masked in-kernel

    kernel = functools.partial(
        _dice_kernel, rows_total=R, tile_rows=tile_rows, chunk_rows=chunk_rows)

    in_spec = pl.BlockSpec((1, tile_rows, _LANES), lambda b, k: (b, k, 0))
    out_spec = pl.BlockSpec((1, 1, _LANES), lambda b, k: (b, 0, 0))

    per_batch = pl.pallas_call(
        kernel,
        out_shape=jax.ShapeDtypeStruct((N, 1, _LANES), jnp.float32),
        grid_spec=pltpu.PrefetchScalarGridSpec(
            num_scalar_prefetch=0,
            grid=(N, K),
            in_specs=[in_spec, in_spec],
            out_specs=out_spec,
            scratch_shapes=[
                pltpu.VMEM((8, _LANES), jnp.float32),   # intersection partials
                pltpu.VMEM((8, _LANES), jnp.float32),   # union partials
            ],
        ),
        compiler_params=pltpu.CompilerParams(
            # Batch axis independent (megacore on v7x); feature axis is the
            # sequential reduction into the scratch accumulators.
            # TODO(synk): for v7x with N == 1, split the feature axis into a
            # leading size-2 "parallel" dim emitting partial (inter, union)
            # sums so both TensorCores are used.
            dimension_semantics=("parallel", "arbitrary"),
        ),
    )(p, t)

    dice_per_batch = per_batch[:, 0, 0]     # (N,)
    return 1.0 - jnp.sum(dice_per_batch) / float(N)


def _dice_loss_ref(pred, target):
    """Pure-JAX reference mirroring the PyTorch forward exactly."""
    num = pred.shape[0]
    p = pred.reshape(num, -1)
    t = target.reshape(num, -1)
    intersection = (p * t).sum(1)
    union = p.sum(1) + t.sum(1)
    dice = 2.0 * intersection / (union + 1e-08)
    dice = dice.sum() / num
    return 1.0 - dice


if __name__ == "__main__":
    key = jax.random.PRNGKey(0)
    k1, k2 = jax.random.split(key)
    # (batch, num_classes, height, width)
    pred = jax.random.uniform(k1, (2, 4, 16, 16), dtype=jnp.float32)
    target = (jax.random.uniform(k2, (2, 4, 16, 16)) > 0.5).astype(jnp.float32)

    loss = dice_loss(pred, target)
    jax.block_until_ready(loss)

    ref = _dice_loss_ref(pred, target)
    np.testing.assert_allclose(np.asarray(loss), np.asarray(ref), rtol=1e-5, atol=1e-6)

    print("KERNEL_OK")
</pallas_src>

<mosaic_0001>
module attributes {stable_mosaic.version = 11 : i64} {
  func.func @_dice_kernel(%arg0: i32, %arg1: i32, %arg2: memref<1x8x128xf32, #tpu.memory_space<vmem>>, %arg3: memref<1x8x128xf32, #tpu.memory_space<vmem>>, %arg4: memref<1x1x128xf32, #tpu.memory_space<vmem>>, %arg5: memref<8x128xf32, #tpu.memory_space<vmem>>, %arg6: memref<8x128xf32, #tpu.memory_space<vmem>>) attributes {dimension_semantics = [#tpu.dimension_semantics<parallel>, #tpu.dimension_semantics<arbitrary>], iteration_bounds = array<i64: 2, 1>, scalar_prefetch = 0 : i64, scratch_operands = 2 : i64, tpu.core_type = #tpu.core_type<tc>, window_params = [{transform_indices = @transform_0, window_bounds = array<i64: 1, 8, 128>}, {transform_indices = @transform_1, window_bounds = array<i64: 1, 8, 128>}, {transform_indices = @transform_2, window_bounds = array<i64: 1, 1, 128>}]} {
    %c0_i32 = arith.constant 0 : i32
    %0 = arith.cmpi eq, %arg1, %c0_i32 : i32
    %1 = arith.extui %0 : i1 to i32
    %c0_i32_0 = arith.constant 0 : i32
    %2 = arith.cmpi ne, %1, %c0_i32_0 : i32
    scf.if %2 {
      %cst_20 = arith.constant 0.000000e+00 : f32
      %37 = vector.broadcast %cst_20 : f32 to vector<8x128xf32>
      %c0_21 = arith.constant 0 : index
      %c0_22 = arith.constant 0 : index
      %38 = vector.load %arg5[%c0_21, %c0_22] : memref<8x128xf32, #tpu.memory_space<vmem>>, vector<8x128xf32>
      tpu.vector_store %arg5[%c0_21, %c0_22], %37 {strides = array<i32>} : memref<8x128xf32, #tpu.memory_space<vmem>>, vector<8x128xf32>,
      %cst_23 = arith.constant 0.000000e+00 : f32
      %39 = vector.broadcast %cst_23 : f32 to vector<8x128xf32>
      %c0_24 = arith.constant 0 : index
      %c0_25 = arith.constant 0 : index
      %40 = vector.load %arg6[%c0_24, %c0_25] : memref<8x128xf32, #tpu.memory_space<vmem>>, vector<8x128xf32>
      tpu.vector_store %arg6[%c0_24, %c0_25], %39 {strides = array<i32>} : memref<8x128xf32, #tpu.memory_space<vmem>>, vector<8x128xf32>,
    } else {
    }
    %c8_i32 = arith.constant 8 : i32
    %3 = arith.muli %arg1, %c8_i32 : i32
    %c8_i32_1 = arith.constant 8 : i32
    %4 = arith.subi %c8_i32_1, %3 : i32
    %c0 = arith.constant 0 : index
    %c0_2 = arith.constant 0 : index
    %5 = vector.load %arg5[%c0, %c0_2] : memref<8x128xf32, #tpu.memory_space<vmem>>, vector<8x128xf32>
    %c0_3 = arith.constant 0 : index
    %c0_4 = arith.constant 0 : index
    %6 = vector.load %arg6[%c0_3, %c0_4] : memref<8x128xf32, #tpu.memory_space<vmem>>, vector<8x128xf32>
    %c0_i32_5 = arith.constant 0 : i32
    %c8_i32_6 = arith.constant 8 : i32
    %7 = arith.muli %c0_i32_5, %c8_i32_6 : i32
    %8 = tpu.assume_multiple %7, 8 : i32
    %c0_7 = arith.constant 0 : index
    %9 = arith.index_cast %8 : i32 to index
    %c0_8 = arith.constant 0 : index
    %10 = vector.load %arg2[%c0_7, %9, %c0_8] : memref<1x8x128xf32, #tpu.memory_space<vmem>>, vector<1x8x128xf32>
    %11 = vector.shape_cast %10 : vector<1x8x128xf32> to vector<8x128xf32>
    %c0_9 = arith.constant 0 : index
    %12 = arith.index_cast %8 : i32 to index
    %c0_10 = arith.constant 0 : index
    %13 = vector.load %arg3[%c0_9, %12, %c0_10] : memref<1x8x128xf32, #tpu.memory_space<vmem>>, vector<1x8x128xf32>
    %14 = vector.shape_cast %13 : vector<1x8x128xf32> to vector<8x128xf32>
    %15 = tpu.iota {dimensions = array<i32: 0>} : vector<8x128xi32>
    %16 = vector.broadcast %8 : i32 to vector<8x128xi32>
    %17 = arith.addi %16, %15 : vector<8x128xi32>
    %18 = vector.broadcast %4 : i32 to vector<8x128xi32>
    %19 = arith.cmpi slt, %17, %18 : vector<8x128xi32>
    %cst = arith.constant 0.000000e+00 : f32
    %20 = vector.broadcast %cst : f32 to vector<8x128xf32>
    %21 = arith.select %19, %11, %20 : vector<8x128xi1>, vector<8x128xf32>
    %cst_11 = arith.constant 0.000000e+00 : f32
    %22 = vector.broadcast %cst_11 : f32 to vector<8x128xf32>
    %23 = arith.select %19, %14, %22 : vector<8x128xi1>, vector<8x128xf32>
    %24 = arith.mulf %21, %23 : vector<8x128xf32>
    %25 = vector.shape_cast %24 : vector<8x128xf32> to vector<1x8x128xf32>
    %cst_12 = arith.constant dense<0.000000e+00> : vector<8x128xf32>
    %26 = vector.multi_reduction <add>, %25, %cst_12 [0] : vector<1x8x128xf32> to vector<8x128xf32>
    %27 = arith.addf %5, %26 : vector<8x128xf32>
    %28 = arith.addf %21, %23 : vector<8x128xf32>
    %29 = vector.shape_cast %28 : vector<8x128xf32> to vector<1x8x128xf32>
    %cst_13 = arith.constant dense<0.000000e+00> : vector<8x128xf32>
    %30 = vector.multi_reduction <add>, %29, %cst_13 [0] : vector<1x8x128xf32> to vector<8x128xf32>
    %31 = arith.addf %6, %30 : vector<8x128xf32>
    %c1_i32 = arith.constant 1 : i32
    %c0_14 = arith.constant 0 : index
    %c0_15 = arith.constant 0 : index
    %32 = vector.load %arg5[%c0_14, %c0_15] : memref<8x128xf32, #tpu.memory_space<vmem>>, vector<8x128xf32>
    tpu.vector_store %arg5[%c0_14, %c0_15], %27 {strides = array<i32>} : memref<8x128xf32, #tpu.memory_space<vmem>>, vector<8x128xf32>,
    %c0_16 = arith.constant 0 : index
    %c0_17 = arith.constant 0 : index
    %33 = vector.load %arg6[%c0_16, %c0_17] : memref<8x128xf32, #tpu.memory_space<vmem>>, vector<8x128xf32>
    tpu.vector_store %arg6[%c0_16, %c0_17], %31 {strides = array<i32>} : memref<8x128xf32, #tpu.memory_space<vmem>>, vector<8x128xf32>,
    %c0_i32_18 = arith.constant 0 : i32
    %34 = arith.cmpi eq, %arg1, %c0_i32_18 : i32
    %35 = arith.extui %34 : i1 to i32
    %c0_i32_19 = arith.constant 0 : i32
    %36 = arith.cmpi ne, %35, %c0_i32_19 : i32
    scf.if %36 {
      %c0_20 = arith.constant 0 : index
      %c0_21 = arith.constant 0 : index
      %37 = vector.load %arg5[%c0_20, %c0_21] : memref<8x128xf32, #tpu.memory_space<vmem>>, vector<8x128xf32>
      %38 = vector.shape_cast %37 : vector<8x128xf32> to vector<1x8x128xf32>
      %cst_22 = arith.constant dense<0.000000e+00> : vector<1xf32>
      %39 = vector.multi_reduction <add>, %38, %cst_22 [1, 2] : vector<1x8x128xf32> to vector<1xf32>
      %40 = vector.shape_cast %39 : vector<1xf32> to vector<1x1x1xf32>
      %41 = vector.extract %40[0, 0, 0] : f32 from vector<1x1x1xf32>
      %c0_23 = arith.constant 0 : index
      %c0_24 = arith.constant 0 : index
      %42 = vector.load %arg6[%c0_23, %c0_24] : memref<8x128xf32, #tpu.memory_space<vmem>>, vector<8x128xf32>
      %43 = vector.shape_cast %42 : vector<8x128xf32> to vector<1x8x128xf32>
      %cst_25 = arith.constant dense<0.000000e+00> : vector<1xf32>
      %44 = vector.multi_reduction <add>, %43, %cst_25 [1, 2] : vector<1x8x128xf32> to vector<1xf32>
      %45 = vector.shape_cast %44 : vector<1xf32> to vector<1x1x1xf32>
      %46 = vector.extract %45[0, 0, 0] : f32 from vector<1x1x1xf32>
      %cst_26 = arith.constant 2.000000e+00 : f32
      %47 = arith.mulf %cst_26, %41 : f32
      %cst_27 = arith.constant 9.99999993E-9 : f32
      %48 = arith.addf %46, %cst_27 : f32
      %49 = arith.divf %47, %48 : f32
      %50 = vector.broadcast %49 : f32 to vector<1x1x128xf32>
      %c0_28 = arith.constant 0 : index
      %c0_29 = arith.constant 0 : index
      %c0_30 = arith.constant 0 : index
      %51 = vector.load %arg4[%c0_28, %c0_29, %c0_30] : memref<1x1x128xf32, #tpu.memory_space<vmem>>, vector<1x1x128xf32>
      tpu.vector_store %arg4[%c0_28, %c0_29, %c0_30], %50 {strides = array<i32>} : memref<1x1x128xf32, #tpu.memory_space<vmem>>, vector<1x1x128xf32>,
    } else {
    }
    return
  }
  func.func @transform_0(%arg0: i32, %arg1: i32) -> (i32, i32, i32) {
    %c0_i32 = arith.constant 0 : i32
    %c0_i32_0 = arith.constant 0 : i32
    return %arg0, %arg1, %c0_i32 : i32, i32, i32
  }
  func.func @transform_1(%arg0: i32, %arg1: i32) -> (i32, i32, i32) {
    %c0_i32 = arith.constant 0 : i32
    %c0_i32_0 = arith.constant 0 : i32
    return %arg0, %arg1, %c0_i32 : i32, i32, i32
  }
  func.func @transform_2(%arg0: i32, %arg1: i32) -> (i32, i32, i32) {
    %c0_i32 = arith.constant 0 : i32
    %c0_i32_0 = arith.constant 0 : i32
    %c0_i32_1 = arith.constant 0 : i32
    return %arg0, %c0_i32, %c0_i32_0 : i32, i32, i32
  }
}

</mosaic_0001>

<bundles_post_ra>
// kernel: tpu_custom_call.1
= control target key start
LH: loop header
LB: loop body
LE: loop exit
PB: predicated region body
PF: predicated region fallthrough
CT: control target
= control target key end

     0   :  { %7 = vsyncpa [#allocation5], 0  ;;  %s860_s0 = inlined_call_operand.hbm [shape: f32[2,8,128], index: 0, kind: input, shape index: {}]   ;;  %s861_s1 = inlined_call_operand.hbm [shape: f32[2,8,128], index: 1, kind: input, shape index: {}]   ;;  %s862_s2 = inlined_call_operand.hbm [shape: f32[2,1,128], index: 2, kind: output, shape index: {}]  }
   0x1   :  { %9 = vsyncpa [#allocation5 + $0x1], 0 }
   0x2   :  { %10 = vsyncpa [#allocation8], 0 }
   0x3   :  { %12 = vsyncpa [#allocation8 + $0x1], 0 }
   0x4   :  { %13 = vsyncpa [#allocation6], 0 }
   0x5   :  { %15 = vsyncpa [#allocation6 + $0x1], 0  ;;  %s639_s9 = smov 0   ;;  %s641_s10 = smov 0  }
   0x6   :  { %s643_s11 = smov 0   ;;  %s645_s12 = smov 0  }
   0x7   :  { %s647_s13 = smov 0   ;;  %s649_s14 = smov 0  }
   0x8 LB: > { %s384_s15 = sadd.s32 4294967295, %s619_s14   ;;  %s385_s16 = sadd.s32 4294967294, %s619_s14   ;;  %s619_s14 = sphi %s649_s14, %s21_s14   ;;  %s615_s13 = sphi %s647_s13, %s882_s13   ;;  %s611_s12 = sphi %s645_s12, %s881_s12   ;;  %s607_s11 = sphi %s643_s11, %s880_s11   ;;  %s603_s10 = sphi %s641_s10, %s879_s10   ;;  %s599_s9 = sphi %s639_s9, %s878_s9  }
   0x9   : > { %s33_s17 = sadd.s32 1, %s615_s13  ;;  %s42_s18 = sadd.s32 1, %s607_s11 }
   0xa   : > { %p35_p0 = scmp.ge.s32.totalorder %s33_s17, 2  ;;  %p49_p1 = scmp.ne.s32.totalorder %s607_s11, %s603_s10 }
   0xb   : > { %p50_p2 = scmp.eq.s32.totalorder %s619_s14, 0  ;;  %p55_p3 = scmp.ne.s32.totalorder %s603_s10, %s599_s9 }
   0xc   : > { %s884_s17 = smov (%p35_p0, %s33_s17), 0  ;;  %p56_p5 = scmp.eq.s32.totalorder %s384_s15, 0 }
   0xd   : > { %p680_p4 = por %p50_p2, %p49_p1  ;;  %s37_s20 = ssub.s32 %s615_s13, %s884_s17 }
   0xe   : > { %p107_p6 = scmp.eq.s32.totalorder %s384_s15, 1  ;;  %p40_p7 = scmp.eq.s32.totalorder %s37_s20, 0 }
   0xf   : > { %p686_p8 = por %p56_p5, %p55_p3  ;;  %p113_p10 = scmp.eq.s32.totalorder %s385_s16, 1 }
  0x10   : > { %p690_p9 = por %p107_p6, %p49_p1  ;;  %p421_p13 = scmp.lt.s32.totalorder %s619_s14, 2 }
  0x11   : > { %s866_s21 = scalar_select %p686_p8, 1, 0 }
  0x12   : > { %s867_s22 = scalar_select %p690_p9, 1, 0 }
  0x13   : > { %s695_s23 = scalar_select %p40_p7, %s607_s11, %s42_s18  }
  0x14   : > { %p697_p11 = por %p113_p10, %p55_p3  ;;  %s704_s25 = sand.u32 1, %s607_s11  }
  0x15   : > { %s388_s26 = sshll.u32 %s704_s25, 3  ;;  %s389_s27 = sshll.u32 %s615_s13, 7 }
  0x16   : > { %s868_s24 = scalar_select %p697_p11, 1, 0 }
  0x17   : > { %s713_s30 = scalar_lea.hbm %s860_s0, %s389_s27  ;;  %s137_s3 = scalar_lea.vmem [#allocation4], %s388_s26 }
  0x18   : > { %s145_s4 = sshll.u32 %s137_s3, 4  ;;  %p721_p0 = pnand %p421_p13, %p680_p4  ;;  %s717_s4 = int_to_ptr.vmem [resolvable:$true] %s145_s4 }
  0x19   : > { %s134_s6 = scalar_lea.sflag [#allocation5], %s704_s25  ;;  %s473_s7 = scalar_lea.hbm %s713_s30, 128 }
  0x1a   : > { %p474_p3 = scmp.ne.s32.totalorder %s713_s30, %s473_s7  ;;  %p475_p5 = pneg %p721_p0 }
  0x1b   : > { %s478_s16 = scalar_lea.hbm %s860_s0, 256  ;;  %p479_p4 = scmp.lt.u32.totalorder %s713_s30, %s860_s0 }
  0x1c   : > { %p476_p6 = pnand %p475_p5, %p474_p3  ;;  %p480_p10 = scmp.lt.u32.totalorder %s478_s16, %s473_s7 }
  0x1d   : > { %p482_p12 = scmp.lt.u32.totalorder %s473_s7, %s713_s30 }
  0x1e   : > { %p477_p7 = pneg %p476_p6  ;;  %p481_p13 = por %p480_p10, %p479_p4 }
  0x20   : > { %p483_p1 = por %p482_p12, %p481_p13 }
  0x22   : > { %p484_p2 = pnand %p483_p1, %p477_p7 }
  0x24   : > { %487 = shalt.err (!%p484_p2)
}
  0x25   : > { %s488_s20 = scalar_lea.vmem %s717_s4, 128  ;;  %s621_s28 = smov [#allocation4]  }
  0x26   : > { %p489_p3 = scmp.ne.s32.totalorder %s717_s4, %s488_s20  ;;  %s493_s29 = sshll.u32 %s621_s28, 4  ;;  %s494_s29 = int_to_ptr.vmem [resolvable:$false] %s493_s29 }
  0x27   : > { %s495_s3 = scalar_lea.vmem %s494_s29, 256  ;;  %p496_p9 = scmp.lt.s32.totalorder %s717_s4, %s494_s29 }
  0x28   : > { %p491_p6 = pnand %p489_p3, %p475_p5  ;;  %p497_p4 = scmp.lt.s32.totalorder %s495_s3, %s488_s20 }
  0x2a   : > { %p492_p11 = pneg %p491_p6  ;;  %p498_p10 = por %p497_p4, %p496_p9 }
  0x2c   : > { %p499_p12 = pnand %p498_p10, %p492_p11 }
  0x2e   : > { %502 = shalt.err (!%p499_p12)
}
  0x2f   : > { %413 = dma.hbm_to_vmem [thread:$0]  (!%p721_p0), %s713_s30, 128, %s717_s4, %s134_s6  }
  0x30   : > { %p870_p1 = scmp.lt.s32.totalorder %s619_s14, 3  ;;  %p871_p2 = scmp.ge.s32.totalorder %s619_s14, 1 }
  0x31   : > { %s766_s16 = scalar_lea.hbm %s861_s1, %s389_s27  ;;  %s156_s18 = scalar_lea.vmem [#allocation7], %s388_s26 }
  0x32   : > { %p757_p7 = pnand %p871_p2, %p870_p1  ;;  %s164_s19 = sshll.u32 %s156_s18, 4  ;;  %s165_s19 = int_to_ptr.vmem [resolvable:$true] %s164_s19 }
  0x33   : > { %s153_s30 = scalar_lea.sflag [#allocation8], %s704_s25  ;;  %s503_s4 = scalar_lea.hbm %s766_s16, 128 }
  0x34   : > { %s872_s7 = scalar_select %p757_p7, 1, 0 }
  0x35   : > { %p504_p9 = scmp.ne.s32.totalorder %s766_s16, %s503_s4  ;;  %s508_s27 = scalar_lea.hbm %s861_s1, 256 }
  0x36   : > { %p509_p3 = scmp.lt.u32.totalorder %s766_s16, %s861_s1  ;;  %p510_p6 = scmp.lt.u32.totalorder %s508_s27, %s503_s4 }
  0x37   : > { %p506_p11 = pnand %p504_p9, %p475_p5  ;;  %p512_p10 = scmp.lt.u32.totalorder %s503_s4, %s766_s16 }
  0x38   : > { %p511_p4 = por %p510_p6, %p509_p3 }
  0x39   : > { %p507_p13 = pneg %p506_p11 }
  0x3a   : > { %p513_p12 = por %p512_p10, %p511_p4 }
  0x3c   : > { %p514_p1 = pnand %p513_p12, %p507_p13 }
  0x3e   : > { %517 = shalt.err (!%p514_p1)
}
  0x3f   : > { %s518_s25 = scalar_lea.vmem %s165_s19, 128  ;;  %s622_s26 = smov [#allocation7]  }
  0x40   : > { %p519_p2 = scmp.ne.s32.totalorder %s165_s19, %s518_s25  ;;  %s523_s3 = sshll.u32 %s622_s26, 4  ;;  %s524_s3 = int_to_ptr.vmem [resolvable:$false] %s523_s3 }
  0x41   : > { %s525_s8 = scalar_lea.vmem %s524_s3, 256  ;;  %p526_p8 = scmp.lt.s32.totalorder %s165_s19, %s524_s3 }
  0x42   : > { %p521_p9 = pnand %p519_p2, %p475_p5  ;;  %p527_p7 = scmp.lt.s32.totalorder %s525_s8, %s518_s25 }
  0x44   : > { %p522_p11 = pneg %p521_p9  ;;  %p528_p3 = por %p527_p7, %p526_p8 }
  0x46   : > { %p529_p6 = pnand %p528_p3, %p522_p11 }
  0x48   : > { %532 = shalt.err (!%p529_p6)
}
  0x49   : > { %416 = dma.hbm_to_vmem [thread:$0]  (!%p721_p0), %s766_s16, 128, %s165_s19, %s153_s30  }
  0x4a   : > { %p873_p13 = scmp.ne.s32.totalorder %s872_s7, 0 }
  0x4b   : > { %s793_s15 = sand.u32 (!%p873_p13), 1, %s603_s10   ;;  %p874_p5 = scmp.ne.s32.totalorder (!%p873_p13), %s866_s21, 0 }
  0x4c   : > { %173 = sbr.rel (%p873_p13) target bundleno = 378 (0x17a), region = 28  ;;  %s393_s18 = sshll.u32 (!%p873_p13), %s793_s15, 3 }
  0x4d   : > { %s176_s4 = scalar_lea.sflag (!%p873_p13), [#allocation5], %s793_s15  ;;  %s179_s6 = scalar_lea.vmem (!%p873_p13), [#allocation4], %s393_s18 }
  0x53   : > { %586 = dma.done.wait (%p874_p5), %s176_s4, 128  }
  0x54   : > { %588 = vsyncadd (%p874_p5), %s176_s4, 4294967168  ;;  %s185_s5 = scalar_lea.sflag [#allocation8], %s793_s15  ;;  %s188_s16 = scalar_lea.vmem [#allocation7], %s393_s18 }
  0x55   : > { %590 = dma.done.wait (%p874_p5), %s185_s5, 128  }
  0x56   : > { %592 = vsyncadd (%p874_p5), %s185_s5, 4294967168  ;;  %v223_v0 = vld [vmem:[%s179_s6] sm:$0xff]  ;;  %v224_v1 = vld [vmem:[%s188_s16] sm:$0xff]  ;;  %s395_s30 = sshll.u32 %s611_s12, 4  ;;  %s212_s27 = scalar_lea.vmem [#allocation9], %s793_s15 }
  0x57   : > { %v233_v2 = vmul.f32 %v224_v1, %v223_v0  ;;  %v236_v3 = vadd.f32 %v224_v1, %v223_v0  ;;  %s285_s28 = sshll.u32 %s212_s27, 4  ;;  %s811_s8 = scalar_lea.hbm %s862_s2, %s395_s30  ;;  %s813_s28 = int_to_ptr.vmem [resolvable:$true] %s285_s28 }
  0x58   : > { %s273_s18 = scalar_lea.sflag [#allocation6], %s793_s15  ;;  %s533_s4 = scalar_lea.vmem %s813_s28, 16 }
  0x59   : > { %245 = vadd.xlane.f32.xlu0 %v233_v2  ;;  %p534_p8 = scmp.ne.s32.totalorder %s813_s28, %s533_s4  ;;  %p875_p0 = scmp.ne.s32.totalorder %s867_s22, 0 }
  0x5a   : > { %s623_s12 = smov [#allocation9]  }
  0x5b   : > { %p535_p7 = pnand %p534_p8, %p875_p0  ;;  %s537_s6 = sshll.u32 %s623_s12, 4  ;;  %s538_s6 = int_to_ptr.vmem [resolvable:$false] %s537_s6 }
  0x5c   : > { %s539_s5 = scalar_lea.vmem %s538_s6, 32  ;;  %p540_p10 = scmp.lt.s32.totalorder %s813_s28, %s538_s6 }
  0x5d   : > { %255 = vadd.xlane.f32.xlu0 %v236_v3  ;;  %p536_p4 = pneg %p535_p7  ;;  %p541_p12 = scmp.lt.s32.totalorder %s539_s5, %s533_s4 }
  0x5f   : > { %p542_p1 = por %p541_p12, %p540_p10 }
  0x61   : > { %p543_p2 = pnand %p542_p1, %p536_p4 }
  0xe6   : > { %v246_v4 = vpop.xlane.xlu0 %245 }
  0xe7   : > { %v247_v5 = vrot.slane %v246_v4, 4 }
  0xe9   : > { %v248_v6 = vadd.f32 %v247_v5, %v246_v4 }
  0xea   : > { %v256_v7 = vpop.xlane.xlu0 %255 }
  0xeb   : > { %v249_v8 = vrot.slane %v248_v6, 2  ;;  %v257_v9 = vrot.slane %v256_v7, 4 }
  0xed   : > { %v258_v10 = vadd.f32 %v257_v9, %v256_v7  ;;  %v250_v11 = vadd.f32 %v249_v8, %v248_v6 }
  0xef   : > { %v259_v12 = vrot.slane %v258_v10, 2  ;;  %v251_v13 = vrot.slane %v250_v11, 1 }
  0xf1   : > { %v260_v14 = vadd.f32 %v259_v12, %v258_v10  ;;  %v252_v15 = vadd.f32 %v251_v13, %v250_v11 }
  0xf3   : > { %398 = vpush %v252_v15  ;;  %v261_v16 = vrot.slane %v260_v14, 1 }
  0xf5   : > { %v262_v17 = vadd.f32 %v261_v16, %v260_v14 }
  0xf7   : > { %400 = vpush %v262_v17 }
 0x124   : > { %s399_s21 = spop %398 }
 0x125   : > { %s264_s20 = smul.f32 2.0, %s399_s21 }
 0x128   : > { %s401_s7 = spop %400 }
 0x129   : > { %s265_s19 = sadd.f32 1e-08, %s401_s7 }
 0x12b   : > { %v266_v18 = vstv %s265_s19 }
 0x12c   : > { %471 = vrcp.f32 %v266_v18 }
 0x136   : > { %v472_v19 = vpop.eup %471 }
 0x137   : > { %402 = vpush %v472_v19 }
 0x168   : > { %s403_s29 = spop %402 }
 0x169   : > { %s269_s25 = smul.f32 %s403_s29, %s264_s20 }
 0x16b   : > { %v270_v20 = vstv %s269_s25 }
 0x16c   : > { %271 = vst [vmem:[%s212_s27] sm:$0x1] %v270_v20 }
 0x16d   : > { %546 = shalt.err (!%p543_p2)
}
 0x16e   : > { %s547_s15 = scalar_lea.hbm %s811_s8, 16  ;;  %s551_s7 = scalar_lea.hbm %s862_s2, 32 }
 0x16f   : > { %p548_p9 = scmp.ne.s32.totalorder %s811_s8, %s547_s15  ;;  %p552_p6 = scmp.lt.u32.totalorder %s811_s8, %s862_s2 }
 0x170   : > { %p553_p13 = scmp.lt.u32.totalorder %s551_s7, %s547_s15  ;;  %p555_p8 = scmp.lt.u32.totalorder %s547_s15, %s811_s8 }
 0x171   : > { %p549_p11 = pnand %p548_p9, %p875_p0 }
 0x172   : > { %p554_p5 = por %p553_p13, %p552_p6 }
 0x173   : > { %p550_p3 = pneg %p549_p11 }
 0x174   : > { %p556_p7 = por %p555_p8, %p554_p5 }
 0x176   : > { %p557_p4 = pnand %p556_p7, %p550_p3 }
 0x178   : > { %560 = shalt.err (!%p557_p4)
}
 0x179   : > { %408 = dma.vmem_to_hbm [thread:$0]  (%p875_p0), %s813_s28, 16, %s811_s8, %s273_s18  }
 0x17a PF: > { %s297_s20 = sand.u32 1, %s599_s9   ;;  %p876_p10 = scmp.ne.s32.totalorder %s868_s24, 0 }
 0x17b   : > { %p877_p12 = scmp.ge.s32.totalorder %s619_s14, 2  ;;  %s298_s27 = scalar_lea.sflag [#allocation6], %s297_s20 }
 0x17d   : > { %p418_p1 = pnand %p877_p12, %p876_p10 }
 0x17f   : > { %594 = dma.done.wait (!%p418_p1), %s298_s27, 16  }
 0x180   : > { %596 = vsyncadd (!%p418_p1), %s298_s27, 4294967280  ;;  %s21_s14 = sadd.s32 1, %s619_s14   ;;  %s878_s9 = smov %s603_s10 }
 0x181   : > { %p18_p2 = scmp.ge.s32.totalorder %s21_s14, 4   ;;  %s879_s10 = smov %s607_s11 }
 0x182   : > { %s880_s11 = smov %s695_s23  ;;  %s881_s12 = smov %s615_s13 }
 0x183   : > { %s882_s13 = smov %s884_s17  ;;  %20 = sbr.rel (!%p18_p2) target bundleno = 8 (0x8), region = 94 }
 0x18a   :  { %302 = vsyncpa [#allocation5], 1 }
 0x18b   :  { %304 = vsyncpa [#allocation5 + $0x1], 1 }
 0x18c   :  { %305 = vsyncpa [#allocation8], 1 }
 0x18d   :  { %307 = vsyncpa [#allocation8 + $0x1], 1 }
 0x18e   :  { %308 = vsyncpa [#allocation6], 1 }
 0x18f   :  { %310 = vsyncpa [#allocation6 + $0x1], 1 }

</bundles_post_ra>
